<compile_context>
chip_gen: v7x
topology: tpu7x:2x2x1
jax: 0.10.0
libtpu: 0.0.40
codegen_flags: <defaults>
</compile_context>

<pallas_src>
import jax
import jax.numpy as jnp
from jax.experimental import pallas as pl
from jax.experimental.pallas import tpu as pltpu


# ----------------------------------------------------------------------------
# Fused kernel body:  o = GELU(x @ W1 + b1) @ W2 + b2
# ----------------------------------------------------------------------------
def _mlp_kernel(x_ref, w1_ref, b1_ref, w2_ref, b2_ref, o_ref):
    # x_ref: (TM, Din)   w1_ref: (Din, Dh)   b1_ref: (1, Dh)
    # w2_ref: (Dh, Dout) b2_ref: (1, Dout)   o_ref: (TM, Dout)
    h = jnp.dot(x_ref[...], w1_ref[...], preferred_element_type=jnp.float32)
    h = h + b1_ref[...]
    # Exact GELU (erf form) -> matches torch.nn.GELU() default.
    h = 0.5 * h * (1.0 + jax.lax.erf(h * 0.7071067811865476))
    # Dropout(p=0.0) is the identity; nothing to do.
    y = jnp.dot(h, w2_ref[...], preferred_element_type=jnp.float32)
    o_ref[...] = (y + b2_ref[...]).astype(o_ref.dtype)


def _round_up(x, m):
    return ((x + m - 1) // m) * m


def _pick_tile_m(din_p, dh_p, dout_p, m, budget_bytes=12 * 1024 * 1024):
    """Largest row tile (multiple of 8, <= 512) whose VMEM footprint fits the budget."""
    def vmem_bytes(tm):
        dbl_io = 2 * tm * (din_p + dout_p) * 4                          # x / out, 2x buffered
        weights = (din_p * dh_p + dh_p * dout_p + dh_p + dout_p) * 4    # resident params
        hidden = tm * dh_p * 4                                          # live intermediate
        return dbl_io + weights + hidden

    tm = 8
    for cand in (512, 256, 128, 64, 32, 16, 8):
        if vmem_bytes(cand) <= budget_bytes:
            tm = cand
            break
    # Never tile wider than the (8-aligned) problem itself: avoids wasted zero rows
    # on tiny inputs while still never falling back to an unbounded TM = M.
    return min(tm, _round_up(max(m, 1), 8))


# ----------------------------------------------------------------------------
# Wrapper: pad to lane-dense shapes, launch the fused kernel, un-pad.
# ----------------------------------------------------------------------------
def mlp_forward(x, params):
    """x: (B, L, Din) f32 -> (B, L, Dout) f32.  Matches Mlp.forward with drop=0.0."""
    w1, b1, w2, b2 = params["w1"], params["b1"], params["w2"], params["b2"]
    B, L, Din = x.shape
    Dh = w1.shape[1]
    Dout = w2.shape[1]
    M = B * L

    Din_p = _round_up(Din, 128)
    Dh_p = _round_up(Dh, 128)
    Dout_p = _round_up(Dout, 128)

    TM = _pick_tile_m(Din_p, Dh_p, Dout_p, M)
    M_p = _round_up(M, TM)

    x2 = x.reshape(M, Din)
    x_p = jnp.pad(x2, ((0, M_p - M), (0, Din_p - Din)))
    w1_p = jnp.pad(w1, ((0, Din_p - Din), (0, Dh_p - Dh)))
    b1_p = jnp.pad(b1, (0, Dh_p - Dh)).reshape(1, Dh_p)
    w2_p = jnp.pad(w2, ((0, Dh_p - Dh), (0, Dout_p - Dout)))
    b2_p = jnp.pad(b2, (0, Dout_p - Dout)).reshape(1, Dout_p)

    cost = pl.CostEstimate(
        flops=2 * M_p * (Din_p * Dh_p + Dh_p * Dout_p),
        transcendentals=M_p * Dh_p,
        bytes_accessed=4 * (M_p * Din_p + M_p * Dout_p
                            + Din_p * Dh_p + Dh_p * Dout_p + Dh_p + Dout_p),
    )

    out_p = pl.pallas_call(
        _mlp_kernel,
        out_shape=jax.ShapeDtypeStruct((M_p, Dout_p), jnp.float32),
        grid_spec=pltpu.PrefetchScalarGridSpec(
            num_scalar_prefetch=0,
            grid=(M_p // TM,),
            in_specs=[
                pl.BlockSpec((TM, Din_p), lambda i: (i, 0)),
                pl.BlockSpec((Din_p, Dh_p), lambda i: (0, 0)),   # resident weights
                pl.BlockSpec((1, Dh_p), lambda i: (0, 0)),
                pl.BlockSpec((Dh_p, Dout_p), lambda i: (0, 0)),
                pl.BlockSpec((1, Dout_p), lambda i: (0, 0)),
            ],
            out_specs=pl.BlockSpec((TM, Dout_p), lambda i: (i, 0)),
        ),
        compiler_params=pltpu.CompilerParams(
            dimension_semantics=("parallel",)),
        cost_estimate=cost,
    )(x_p, w1_p, b1_p, w2_p, b2_p)

    return out_p[:M, :Dout].reshape(B, L, Dout)
    # TODO(synk): training-mode Dropout with p > 0 would need pltpu.prng_seed /
    # pltpu.prng_random_bits inside the kernel; module default p=0.0 is the identity.


def init_params(in_features, hidden_features, out_features, key):
    # nn.Linear stores weight as (out, in); kept here transposed as (in, out).
    k1, k2, k3, k4 = jax.random.split(key, 4)
    s1 = 1.0 / jnp.sqrt(in_features)
    s2 = 1.0 / jnp.sqrt(hidden_features)
    return {
        "w1": s1 * jax.random.normal(k1, (in_features, hidden_features), jnp.float32),
        "b1": s1 * jax.random.normal(k2, (hidden_features,), jnp.float32),
        "w2": s2 * jax.random.normal(k3, (hidden_features, out_features), jnp.float32),
        "b2": s2 * jax.random.normal(k4, (out_features,), jnp.float32),
    }


if __name__ == "__main__":
    B, L = 2, 8
    in_features, hidden_features = 32, 32
    out_features = in_features            # Mlp default: out_features or in_features

    key = jax.random.PRNGKey(0)
    kx, kp = jax.random.split(key)
    x = jax.random.normal(kx, (B, L, in_features), jnp.float32)
    params = init_params(in_features, hidden_features, out_features, kp)

    fwd = jax.jit(mlp_forward)
    out = jax.block_until_ready(fwd(x, params))

    # Pure-JAX reference (exact-erf GELU, p=0 dropout) for a correctness sanity check.
    h_ref = x.reshape(B * L, in_features) @ params["w1"] + params["b1"]
    h_ref = 0.5 * h_ref * (1.0 + jax.lax.erf(h_ref / jnp.sqrt(2.0)))
    ref = (h_ref @ params["w2"] + params["b2"]).reshape(B, L, out_features)

    assert out.shape == (B, L, out_features), out.shape
    assert bool(jnp.all(jnp.isfinite(out)))
    assert jnp.allclose(out, ref, atol=1e-5, rtol=1e-5), float(jnp.abs(out - ref).max())
    print("KERNEL_OK")
</pallas_src>

<mosaic_0001>
module attributes {stable_mosaic.version = 11 : i64} {
  func.func @_mlp_kernel(%arg0: i32, %arg1: memref<16x128xf32, #tpu.memory_space<vmem>>, %arg2: memref<128x128xf32, #tpu.memory_space<vmem>>, %arg3: memref<1x128xf32, #tpu.memory_space<vmem>>, %arg4: memref<128x128xf32, #tpu.memory_space<vmem>>, %arg5: memref<1x128xf32, #tpu.memory_space<vmem>>, %arg6: memref<16x128xf32, #tpu.memory_space<vmem>>) attributes {dimension_semantics = [#tpu.dimension_semantics<parallel>], iteration_bounds = array<i64: 1>, scalar_prefetch = 0 : i64, scratch_operands = 0 : i64, tpu.core_type = #tpu.core_type<tc>, window_params = [{transform_indices = @transform_0, window_bounds = array<i64: 16, 128>}, {pipeline_mode = #tpu.pipeline_mode<synchronous>, transform_indices = @transform_1, window_bounds = array<i64: 128, 128>}, {pipeline_mode = #tpu.pipeline_mode<synchronous>, transform_indices = @transform_2, window_bounds = array<i64: 1, 128>}, {pipeline_mode = #tpu.pipeline_mode<synchronous>, transform_indices = @transform_3, window_bounds = array<i64: 128, 128>}, {pipeline_mode = #tpu.pipeline_mode<synchronous>, transform_indices = @transform_4, window_bounds = array<i64: 1, 128>}, {transform_indices = @transform_5, window_bounds = array<i64: 16, 128>}]} {
    %c0 = arith.constant 0 : index
    %c0_0 = arith.constant 0 : index
    %0 = vector.load %arg1[%c0, %c0_0] : memref<16x128xf32, #tpu.memory_space<vmem>>, vector<16x128xf32>
    %c0_1 = arith.constant 0 : index
    %c0_2 = arith.constant 0 : index
    %1 = vector.load %arg2[%c0_1, %c0_2] : memref<128x128xf32, #tpu.memory_space<vmem>>, vector<128x128xf32>
    %cst = arith.constant dense<0.000000e+00> : vector<16x128xf32>
    %2 = tpu.matmul %0, %1, %cst {dimension_numbers = #tpu.dot_dimension_numbers<[1], [0], [0], [1], [0, 0, 1, 1], [], []>} : vector<16x128xf32>, vector<128x128xf32>, vector<16x128xf32> -> vector<16x128xf32>
    %c0_3 = arith.constant 0 : index
    %c0_4 = arith.constant 0 : index
    %3 = vector.load %arg3[%c0_3, %c0_4] : memref<1x128xf32, #tpu.memory_space<vmem>>, vector<1x128xf32>
    %4 = vector.broadcast %3 : vector<1x128xf32> to vector<16x128xf32>
    %5 = arith.addf %2, %4 : vector<16x128xf32>
    %cst_5 = arith.constant 5.000000e-01 : f32
    %6 = vector.broadcast %cst_5 : f32 to vector<16x128xf32>
    %7 = arith.mulf %6, %5 : vector<16x128xf32>
    %cst_6 = arith.constant 0.707106769 : f32
    %8 = vector.broadcast %cst_6 : f32 to vector<16x128xf32>
    %9 = arith.mulf %5, %8 : vector<16x128xf32>
    %10 = math.erf %9 : vector<16x128xf32>
    %cst_7 = arith.constant 1.000000e+00 : f32
    %11 = vector.broadcast %cst_7 : f32 to vector<16x128xf32>
    %12 = arith.addf %11, %10 : vector<16x128xf32>
    %13 = arith.mulf %7, %12 : vector<16x128xf32>
    %c0_8 = arith.constant 0 : index
    %c0_9 = arith.constant 0 : index
    %14 = vector.load %arg4[%c0_8, %c0_9] : memref<128x128xf32, #tpu.memory_space<vmem>>, vector<128x128xf32>
    %cst_10 = arith.constant dense<0.000000e+00> : vector<16x128xf32>
    %15 = tpu.matmul %13, %14, %cst_10 {dimension_numbers = #tpu.dot_dimension_numbers<[1], [0], [0], [1], [0, 0, 1, 1], [], []>} : vector<16x128xf32>, vector<128x128xf32>, vector<16x128xf32> -> vector<16x128xf32>
    %c0_11 = arith.constant 0 : index
    %c0_12 = arith.constant 0 : index
    %16 = vector.load %arg5[%c0_11, %c0_12] : memref<1x128xf32, #tpu.memory_space<vmem>>, vector<1x128xf32>
    %17 = vector.broadcast %16 : vector<1x128xf32> to vector<16x128xf32>
    %18 = arith.addf %15, %17 : vector<16x128xf32>
    %c0_13 = arith.constant 0 : index
    %c0_14 = arith.constant 0 : index
    %19 = vector.load %arg6[%c0_13, %c0_14] : memref<16x128xf32, #tpu.memory_space<vmem>>, vector<16x128xf32>
    tpu.vector_store %arg6[%c0_13, %c0_14], %18 {strides = array<i32>} : memref<16x128xf32, #tpu.memory_space<vmem>>, vector<16x128xf32>,
    return
  }
  func.func @transform_0(%arg0: i32) -> (i32, i32) {
    %c0_i32 = arith.constant 0 : i32
    %c0_i32_0 = arith.constant 0 : i32
    return %arg0, %c0_i32 : i32, i32
  }
  func.func @transform_1(%arg0: i32) -> (i32, i32) {
    %c0_i32 = arith.constant 0 : i32
    %c0_i32_0 = arith.constant 0 : i32
    %c0_i32_1 = arith.constant 0 : i32
    return %c0_i32, %c0_i32_0 : i32, i32
  }
  func.func @transform_2(%arg0: i32) -> (i32, i32) {
    %c0_i32 = arith.constant 0 : i32
    %c0_i32_0 = arith.constant 0 : i32
    %c0_i32_1 = arith.constant 0 : i32
    return %c0_i32, %c0_i32_0 : i32, i32
  }
  func.func @transform_3(%arg0: i32) -> (i32, i32) {
    %c0_i32 = arith.constant 0 : i32
    %c0_i32_0 = arith.constant 0 : i32
    %c0_i32_1 = arith.constant 0 : i32
    return %c0_i32, %c0_i32_0 : i32, i32
  }
  func.func @transform_4(%arg0: i32) -> (i32, i32) {
    %c0_i32 = arith.constant 0 : i32
    %c0_i32_0 = arith.constant 0 : i32
    %c0_i32_1 = arith.constant 0 : i32
    return %c0_i32, %c0_i32_0 : i32, i32
  }
  func.func @transform_5(%arg0: i32) -> (i32, i32) {
    %c0_i32 = arith.constant 0 : i32
    %c0_i32_0 = arith.constant 0 : i32
    return %arg0, %c0_i32 : i32, i32
  }
}

</mosaic_0001>

<bundles_post_ra>
// kernel: mlp_forward.1
= control target key start
LH: loop header
LB: loop body
LE: loop exit
PB: predicated region body
PF: predicated region fallthrough
CT: control target
= control target key end

     0   :  { %s554_s1 = inlined_call_operand.vmem [shape: f32[128,128], index: 1, kind: input, shape index: {}]   ;;  %s555_s0 = inlined_call_operand.vmem [shape: f32[16,128], index: 0, kind: input, shape index: {}]   ;;  %s556_s3 = inlined_call_operand.vmem [shape: f32[128,128], index: 3, kind: input, shape index: {}]   ;;  %s557_s2 = inlined_call_operand.vmem [shape: f32[1,128], index: 2, kind: input, shape index: {}]   ;;  %s558_s4 = inlined_call_operand.vmem [shape: f32[1,128], index: 4, kind: input, shape index: {}]   ;;  %s559_s5 = inlined_call_operand.vmem [shape: f32[16,128], index: 5, kind: output, shape index: {}]  }
   0x1   :  { %v22_v0 = vld [vmem:[%s554_s1] sm:$0xff]  ;;  %v23_v1 = vld [vmem:[%s554_s1 + $0x8] sm:$0xff]  ;;  %v24_v2 = vld [vmem:[%s554_s1 + $0x10] sm:$0xff] }
   0x2   :  { %v342_v3 = vpack.c.bf16 %v23_v1, %v22_v0  ;;  %v25_v4 = vld [vmem:[%s554_s1 + $0x18] sm:$0xff]  ;;  %v26_v6 = vld [vmem:[%s554_s1 + $0x20] sm:$0xff]  ;;  %v27_v7 = vld [vmem:[%s554_s1 + $0x28] sm:$0xff] }
   0x3   :  { %v346_v5 = vpack.c.bf16 %v25_v4, %v24_v2  ;;  %v350_v8 = vpack.c.bf16 %v27_v7, %v26_v6  ;;  %v28_v9 = vld [vmem:[%s554_s1 + $0x30] sm:$0xff]  ;;  %v29_v10 = vld [vmem:[%s554_s1 + $0x38] sm:$0xff]  ;;  %v20_v11 = vld [vmem:[%s555_s0] sm:$0xff] }
   0x4   :  { %343 = vmatprep.subr.bf16.mxu0 %v342_v3  ;;  %304 = vmatprep.mubr.f32.mxu0 %v20_v11  ;;  %v130_v12 = vld [vmem:[%s556_s3] sm:$0xff]  ;;  %v131_v13 = vld [vmem:[%s556_s3 + $0x8] sm:$0xff]  ;;  %v132_v14 = vld [vmem:[%s556_s3 + $0x10] sm:$0xff]  ;;  %v354_v20 = vpack.c.bf16 %v29_v10, %v28_v9 }
   0x5   :  { %345 = vmatpush3.bf16.msra.mxu0 %v342_v3  ;;  %v374_v15 = vpack.c.bf16 %v131_v13, %v130_v12  ;;  %v133_v16 = vld [vmem:[%s556_s3 + $0x18] sm:$0xff]  ;;  %v134_v18 = vld [vmem:[%s556_s3 + $0x20] sm:$0xff]  ;;  %v135_v19 = vld [vmem:[%s556_s3 + $0x28] sm:$0xff] }
   0x6   :  { %347 = vmatprep.subr.bf16.mxu0 %v346_v5  ;;  %v378_v17 = vpack.c.bf16 %v133_v16, %v132_v14  ;;  %v30_v21 = vld [vmem:[%s554_s1 + $0x40] sm:$0xff]  ;;  %v31_v22 = vld [vmem:[%s554_s1 + $0x48] sm:$0xff]  ;;  %v382_v23 = vpack.c.bf16 %v135_v19, %v134_v18  ;;  %v32_v25 = vld [vmem:[%s554_s1 + $0x50] sm:$0xff] }
   0x7   :  { %375 = vmatprep.subr.bf16.mxu1 %v374_v15  ;;  %v358_v24 = vpack.c.bf16 %v31_v22, %v30_v21  ;;  %v33_v26 = vld [vmem:[%s554_s1 + $0x58] sm:$0xff]  ;;  %v34_v28 = vld [vmem:[%s554_s1 + $0x60] sm:$0xff]  ;;  %v35_v29 = vld [vmem:[%s554_s1 + $0x68] sm:$0xff] }
   0x8   :  { %377 = vmatpush3.bf16.msra.mxu1 %v374_v15  ;;  %v362_v27 = vpack.c.bf16 %v33_v26, %v32_v25  ;;  %v366_v30 = vpack.c.bf16 %v35_v29, %v34_v28  ;;  %v36_v31 = vld [vmem:[%s554_s1 + $0x70] sm:$0xff]  ;;  %v37_v32 = vld [vmem:[%s554_s1 + $0x78] sm:$0xff]  ;;  %v21_v34 = vld [vmem:[%s555_s0 + $0x8] sm:$0xff] }
   0x9   :  { %349 = vmatpush3.bf16.msra.mxu0 %v346_v5  ;;  %379 = vmatprep.subr.bf16.mxu1 %v378_v17  ;;  %v370_v33 = vpack.c.bf16 %v37_v32, %v36_v31  ;;  %v136_v35 = vld [vmem:[%s556_s3 + $0x30] sm:$0xff]  ;;  %v137_v36 = vld [vmem:[%s556_s3 + $0x38] sm:$0xff]  ;;  %v138_v38 = vld [vmem:[%s556_s3 + $0x40] sm:$0xff] }
   0xa   :  { %351 = vmatprep.subr.bf16.mxu0 %v350_v8  ;;  %v386_v37 = vpack.c.bf16 %v137_v36, %v136_v35  ;;  %v139_v39 = vld [vmem:[%s556_s3 + $0x48] sm:$0xff]  ;;  %v140_v41 = vld [vmem:[%s556_s3 + $0x50] sm:$0xff]  ;;  %v141_v42 = vld [vmem:[%s556_s3 + $0x58] sm:$0xff] }
   0xb   :  { %v390_v40 = vpack.c.bf16 %v139_v39, %v138_v38  ;;  %v394_v43 = vpack.c.bf16 %v141_v42, %v140_v41  ;;  %v142_v44 = vld [vmem:[%s556_s3 + $0x60] sm:$0xff]  ;;  %v143_v45 = vld [vmem:[%s556_s3 + $0x68] sm:$0xff]  ;;  %v144_v47 = vld [vmem:[%s556_s3 + $0x70] sm:$0xff] }
   0xc   :  { %381 = vmatpush3.bf16.msra.mxu1 %v378_v17  ;;  %v398_v46 = vpack.c.bf16 %v143_v45, %v142_v44  ;;  %v145_v48 = vld [vmem:[%s556_s3 + $0x78] sm:$0xff]  ;;  %v234_v50 = vld [vmem:[%s557_s2] ss:$0 sm:$0xff] }
   0xd   :  { %353 = vmatpush3.bf16.msra.mxu0 %v350_v8  ;;  %383 = vmatprep.subr.bf16.mxu1 %v382_v23  ;;  %v402_v49 = vpack.c.bf16 %v145_v48, %v144_v47  ;;  %v235_v1 = vld [vmem:[%s558_s4] ss:$0 sm:$0xff] }
   0xe   :  { %355 = vmatprep.subr.bf16.mxu0 %v354_v20 }
  0x10   :  { %385 = vmatpush3.bf16.msra.mxu1 %v382_v23 }
  0x11   :  { %357 = vmatpush3.bf16.msra.mxu0 %v354_v20  ;;  %387 = vmatprep.subr.bf16.mxu1 %v386_v37 }
  0x12   :  { %359 = vmatprep.subr.bf16.mxu0 %v358_v24 }
  0x14   :  { %389 = vmatpush3.bf16.msra.mxu1 %v386_v37 }
  0x15   :  { %361 = vmatpush3.bf16.msra.mxu0 %v358_v24  ;;  %391 = vmatprep.subr.bf16.mxu1 %v390_v40 }
  0x16   :  { %363 = vmatprep.subr.bf16.mxu0 %v362_v27 }
  0x18   :  { %393 = vmatpush3.bf16.msra.mxu1 %v390_v40 }
  0x19   :  { %365 = vmatpush3.bf16.msra.mxu0 %v362_v27  ;;  %395 = vmatprep.subr.bf16.mxu1 %v394_v43 }
  0x1a   :  { %367 = vmatprep.subr.bf16.mxu0 %v366_v30 }
  0x1c   :  { %397 = vmatpush3.bf16.msra.mxu1 %v394_v43 }
  0x1d   :  { %369 = vmatpush3.bf16.msra.mxu0 %v366_v30  ;;  %399 = vmatprep.subr.bf16.mxu1 %v398_v46 }
  0x1e   :  { %371 = vmatprep.subr.bf16.mxu0 %v370_v33 }
  0x20   :  { %401 = vmatpush3.bf16.msra.mxu1 %v398_v46 }
  0x21   :  { %373 = vmatpush3.bf16.msra.mxu0 %v370_v33  ;;  %403 = vmatprep.subr.bf16.mxu1 %v402_v49 }
  0x24   :  { %305 = vmatmul.mubr.f32.vlgmr.msra.gmra.mrb[0].mxu0 %v21_v34  ;;  %405 = vmatpush3.bf16.msra.mxu1 %v402_v49 }
  0xf7   :  { %v306_v51 = vpop.f32.mrb[0].mxu0 }
  0xf8   :  { %v117_v52 = vadd.f32 %v306_v51, %v234_v50  ;;  %v111_v53 = vpop.f32.mrb[1].mxu0 }
  0xf9   :  { %v112_v54 = vadd.f32 %v234_v50, %v111_v53 }
  0xfa   :  { %v123_v55 = vmul.f32 0.70710677, %v117_v52  ;;  %v121_v62 = vmul.f32 0.5, %v117_v52 }
  0xfb   :  { %v122_v56 = vmul.f32 0.70710677, %v112_v54  ;;  %v120_v60 = vmul.f32 0.5, %v112_v54 }
  0xfc   :  { %406 = verf.f32 %v123_v55 }
  0xfd   :  { %408 = verf.f32 %v122_v56 }
 0x106   :  { %v407_v57 = vpop.eup %406 }
 0x107   :  { %v409_v58 = vpop.eup %408  ;;  %v127_v59 = vadd.f32 1.0, %v407_v57 }
 0x108   :  { %v126_v61 = vadd.f32 1.0, %v409_v58 }
 0x109   :  { %v129_v0 = vmul.f32 %v127_v59, %v121_v62 }
 0x10a   :  { %v128_v63 = vmul.f32 %v126_v61, %v120_v60 }
 0x10c   :  { %339 = vmatprep.mubr.f32.mxu1 %v128_v63 }
 0x10d   :  { %340 = vmatmul.mubr.f32.vlgmr.msra.gmra.mrb[0].mxu1 %v129_v0 }
 0x1e0   :  { %v341_v2 = vpop.f32.mrb[0].mxu1 }
 0x1e1   :  { %v225_v3 = vadd.f32 %v341_v2, %v235_v1  ;;  %v219_v4 = vpop.f32.mrb[1].mxu1 }
 0x1e2   :  { %v220_v5 = vadd.f32 %v235_v1, %v219_v4 }
 0x1e3   :  { %229 = vst [vmem:[%s559_s5 + $0x8] sm:$0xff] %v225_v3 }
 0x1e4   :  { %228 = vst [vmem:[%s559_s5] sm:$0xff] %v220_v5 }

</bundles_post_ra>
